<compile_context>
chip_gen: v7x
topology: tpu7x:2x2x1
jax: 0.10.0
libtpu: 0.0.40
codegen_flags: <defaults>
</compile_context>

<pallas_src>
import functools

import jax
import jax.numpy as jnp
from jax.experimental import pallas as pl
from jax.experimental.pallas import tpu as pltpu


# ----------------------------------------------------------------------------
# Fused kernel: stress partial sums (grid over pair tiles, 2-way core split)
#               + explainer Gram term (once, on core 0 / step 0).
# ----------------------------------------------------------------------------
def _fused_loss_kernel(src_idx_ref, dst_idx_ref, delta_ref, logits_t_ref, imp_ref,
                       err_ref, wgt_ref, expl_ref,
                       *, num_pairs, tile_p, tiles_per_core, n_pad, num_important):
    core = pl.program_id(0)          # "parallel" axis: one value per TensorCore
    step = pl.program_id(1)          # "arbitrary" axis: pair tiles for this core

    # ---- per-core init of resident accumulator blocks (written to HBM once) ----
    @pl.when(step == 0)
    def _init():
        err_ref[...] = jnp.zeros_like(err_ref)
        wgt_ref[...] = jnp.zeros_like(wgt_ref)
        expl_ref[...] = jnp.zeros_like(expl_ref)

    # ---- explainer: sum_{i<j} ||f_i - f_j||_2 via Gram matrix on the MXU ----
    @pl.when(jnp.logical_and(core == 0, step == 0))
    def _explainer():
        f = imp_ref[...]                                                 # [k_pad, D]
        kp = f.shape[0]
        gram = jax.lax.dot_general(f, f, (((1,), (1,)), ((), ())),
                                   preferred_element_type=jnp.float32)  # [k_pad, k_pad]
        rowi = jax.lax.broadcasted_iota(jnp.int32, (kp, kp), 0)
        coli = jax.lax.broadcasted_iota(jnp.int32, (kp, kp), 1)
        r_row = jnp.sum(f * f, axis=1, keepdims=True)                    # [k_pad, 1]
        r_col = jnp.sum(jnp.where(rowi == coli, gram, 0.0),
                        axis=0, keepdims=True)                           # [1, k_pad]
        d2 = jnp.maximum(r_row + r_col - 2.0 * gram, 0.0)  # clamp rounding negatives
        keep = jnp.logical_and(rowi < coli, coli < num_important)
        # PairwiseDistance(eps=1e-16) adds eps far below f32 resolution -> equivalent.
        d = jnp.sqrt(jnp.where(keep, d2, 1.0))             # guard sqrt(0) for grad safety
        expl_ref[...] = jnp.sum(jnp.where(keep, d, 0.0), axis=0, keepdims=True)[None]

    # ---- stress path: fused gather via one-hot matmul (MXU), pairs on lanes ----
    lt = logits_t_ref[...]                                   # [D, n_pad]   (resident)
    idx_s = src_idx_ref[...]                                 # [1, tile_p]  int32
    idx_d = dst_idx_ref[...]
    node = jax.lax.broadcasted_iota(jnp.int32, (n_pad, tile_p), 0)
    oh_s = (node == idx_s).astype(jnp.float32)               # [n_pad, tile_p]
    oh_d = (node == idx_d).astype(jnp.float32)
    src = jnp.dot(lt, oh_s, preferred_element_type=jnp.float32)   # [D, tile_p]
    dst = jnp.dot(lt, oh_d, preferred_element_type=jnp.float32)

    diff = src - dst + 1e-6
    dist = jnp.sqrt(jnp.sum(diff * diff, axis=0, keepdims=True))   # [1, tile_p]
    delta = delta_ref[...]                                          # [1, tile_p]
    err2 = (dist - delta) * (dist - delta)
    w = pl.reciprocal(delta + 1e-7, approx=True)                    # EUP slot (~2^-12 rel)

    base = (core * tiles_per_core + step) * tile_p
    is_full = (base + tile_p) <= num_pairs

    @pl.when(is_full)
    def _full_tile():                                # fast path: no mask / iota / select
        err_ref[...] += err2[None]
        wgt_ref[...] += w[None]

    @pl.when(jnp.logical_not(is_full))
    def _tail_tile():                                # tail: mask padded lanes
        lane = jax.lax.broadcasted_iota(jnp.int32, (1, tile_p), 1)
        valid = (base + lane) < num_pairs
        err_ref[...] += jnp.where(valid, err2, 0.0)[None]
        wgt_ref[...] += jnp.where(valid, w, 0.0)[None]


# ----------------------------------------------------------------------------
# Wrapper reproducing CustomLoss2.forward.
# ----------------------------------------------------------------------------
def custom_loss2(logits, shortest_paths, couples_indices, num_nodes, important_nodes,
                 lambda_explainer=1.0, lambda_stress=1.0):
    # The PyTorch loop adds the pair sum once per node and divides by the node count,
    # which cancels exactly; num_nodes is accepted only for interface parity.
    del num_nodes
    logits = logits.astype(jnp.float32)
    N, D = int(logits.shape[0]), int(logits.shape[1])
    P = int(couples_indices.shape[0])

    sources = couples_indices[:, 0].astype(jnp.int32)
    dest = couples_indices[:, 1].astype(jnp.int32)
    delta = shortest_paths[sources, dest].astype(jnp.float32)       # [P] (tiny gather)

    # Node table: transpose the SMALL [N, D] once (not the big [P, D] gather result) and
    # pad nodes to a lane multiple; the per-pair gather happens inside the kernel.
    n_pad = max(128, ((N + 127) // 128) * 128)
    logits_t = jnp.pad(logits.T, ((0, 0), (0, n_pad - N)))          # [D, n_pad]

    # Important-node features (K x D, tiny) padded to >= 8 rows; padded rows masked in-kernel.
    K = int(important_nodes.shape[0])
    k_pad = max(8, ((K + 7) // 8) * 8)
    imp = logits[important_nodes.astype(jnp.int32)] if K > 0 else jnp.zeros((0, D), jnp.float32)
    imp = jnp.pad(imp, ((0, k_pad - K), (0, 0)))

    # ---- VMEM-aware tile sizing (v7x: 64 MiB/core, v5e/v6e: 128 MiB) ----
    try:
        vmem_cap = int(pltpu.get_tpu_info().vmem_capacity_bytes)
    except Exception:
        vmem_cap = 64 << 20            # conservative: v7x per-TensorCore VMEM

    def footprint(tp):
        stream = 2 * 3 * tp * 4                                   # double-buffered idx/idx/delta
        resident = (D * n_pad + k_pad * D) * 4 + 2 * (2 * tp + k_pad) * 4
        temps = 3 * (n_pad + D) * tp * 4 + 4 * k_pad * k_pad * 4  # one-hots, gathered tiles, gram
        return stream + resident + temps

    budget = vmem_cap // 2
    tile_p = 128
    for cand in (4096, 2048, 1024, 512, 256, 128):                # largest lane-dense tile that fits
        if footprint(cand) <= budget:
            tile_p = cand
            break
    tile_p = min(tile_p, max(128, ((max(P, 1) + 127) // 128) * 128))

    num_tiles = (max(P, 1) + tile_p - 1) // tile_p
    tiles_per_core = (num_tiles + 1) // 2         # leading size-2 "parallel" axis (v7x megacore)
    p_pad = 2 * tiles_per_core * tile_p
    pad = p_pad - P
    src_idx = jnp.pad(sources, (0, pad))[None, :]                       # [1, p_pad] int32
    dst_idx = jnp.pad(dest, (0, pad))[None, :]
    delta_p = jnp.pad(delta, (0, pad), constant_values=1.0)[None, :]    # benign pad, masked anyway

    vmem_limit = int(max(32 << 20, min(2 * footprint(tile_p) + (8 << 20),
                                       (vmem_cap * 3) // 4)))

    kernel = functools.partial(
        _fused_loss_kernel, num_pairs=P, tile_p=tile_p,
        tiles_per_core=tiles_per_core, n_pad=n_pad, num_important=K)

    err_part, wgt_part, expl_part = pl.pallas_call(
        kernel,
        grid=(2, tiles_per_core),
        in_specs=[
            pl.BlockSpec((1, tile_p), lambda c, i: (0, c * tiles_per_core + i)),   # src idx
            pl.BlockSpec((1, tile_p), lambda c, i: (0, c * tiles_per_core + i)),   # dst idx
            pl.BlockSpec((1, tile_p), lambda c, i: (0, c * tiles_per_core + i)),   # delta
            pl.BlockSpec((D, n_pad), lambda c, i: (0, 0)),      # resident node table
            pl.BlockSpec((k_pad, D), lambda c, i: (0, 0)),      # resident important feats
        ],
        out_specs=[
            pl.BlockSpec((1, 1, tile_p), lambda c, i: (c, 0, 0)),   # per-core resident accumulators,
            pl.BlockSpec((1, 1, tile_p), lambda c, i: (c, 0, 0)),   # written to HBM exactly once
            pl.BlockSpec((1, 1, k_pad), lambda c, i: (c, 0, 0)),
        ],
        out_shape=[
            jax.ShapeDtypeStruct((2, 1, tile_p), jnp.float32),
            jax.ShapeDtypeStruct((2, 1, tile_p), jnp.float32),
            jax.ShapeDtypeStruct((2, 1, k_pad), jnp.float32),
        ],
        compiler_params=pltpu.CompilerParams(
            dimension_semantics=("parallel", "arbitrary"),
            vmem_limit_bytes=vmem_limit),
    )(src_idx, dst_idx, delta_p, logits_t, imp)

    mse = jnp.sum(err_part) / P                 # MSELoss (scalar mean over pairs)
    mean_weight = jnp.sum(wgt_part) / P         # mean of 1/(delta + 1e-7)
    stress_loss = mean_weight * mse

    # K <= 1 handled by the in-kernel mask (all-zero partials), matching the PyTorch guard.
    explainer_loss = jnp.sum(expl_part)

    # TODO(synk): g.ndata['feat'] is read in the PyTorch forward but never used, so it is omitted.
    return lambda_stress * stress_loss + lambda_explainer * explainer_loss


# ----------------------------------------------------------------------------
# Pure-JAX reference (correctness sanity check only).
# ----------------------------------------------------------------------------
def _reference_loss(logits, shortest_paths, couples_indices, important_nodes,
                    lambda_explainer=1.0, lambda_stress=1.0):
    logits = logits.astype(jnp.float32)
    s = couples_indices[:, 0]
    d = couples_indices[:, 1]
    delta = shortest_paths[s, d].astype(jnp.float32)
    diff = logits[s] - logits[d] + 1e-6
    dist = jnp.sqrt(jnp.sum(diff * diff, axis=-1))
    mse = jnp.mean((dist - delta) ** 2)
    stress = jnp.mean(1.0 / (delta + 1e-7)) * mse
    f = logits[important_nodes]
    dif = f[:, None, :] - f[None, :, :] + 1e-16
    dm = jnp.sqrt(jnp.sum(dif * dif, axis=-1))
    K = f.shape[0]
    upper = jnp.triu(jnp.ones((K, K), jnp.float32), k=1) > 0
    expl = jnp.sum(jnp.where(upper, dm, 0.0))
    return lambda_stress * stress + lambda_explainer * expl


if __name__ == "__main__":
    key = jax.random.PRNGKey(0)
    k1, k2, k3 = jax.random.split(key, 3)

    N, D, P, K = 8, 32, 24, 4            # nodes, emb dim, pairs, important nodes
    logits = jax.random.normal(k1, (N, D), jnp.float32)
    shortest_paths = jnp.abs(jax.random.normal(k2, (N, N), jnp.float32)) + 0.1
    couples_indices = jax.random.randint(k3, (P, 2), 0, N, dtype=jnp.int32)
    important_nodes = jnp.array([0, 2, 5, 7], dtype=jnp.int32)

    total = custom_loss2(logits, shortest_paths, couples_indices, N, important_nodes)
    total = jax.block_until_ready(total)

    ref = jax.block_until_ready(
        _reference_loss(logits, shortest_paths, couples_indices, important_nodes))
    rel = abs(float(total) - float(ref)) / max(1.0, abs(float(ref)))
    assert rel <= 2e-3, (float(total), float(ref))

    print("KERNEL_OK")
</pallas_src>

<mosaic_0001>
module attributes {stable_mosaic.version = 11 : i64} {
  func.func @_fused_loss_kernel(%arg0: i32, %arg1: i32, %arg2: memref<1x128xi32, #tpu.memory_space<vmem>>, %arg3: memref<1x128xi32, #tpu.memory_space<vmem>>, %arg4: memref<1x128xf32, #tpu.memory_space<vmem>>, %arg5: memref<32x128xf32, #tpu.memory_space<vmem>>, %arg6: memref<8x32xf32, #tpu.memory_space<vmem>>, %arg7: memref<1x1x128xf32, #tpu.memory_space<vmem>>, %arg8: memref<1x1x128xf32, #tpu.memory_space<vmem>>, %arg9: memref<1x1x8xf32, #tpu.memory_space<vmem>>) attributes {dimension_semantics = [#tpu.dimension_semantics<parallel>, #tpu.dimension_semantics<arbitrary>], iteration_bounds = array<i64: 2, 1>, scalar_prefetch = 0 : i64, scratch_operands = 0 : i64, tpu.core_type = #tpu.core_type<tc>, window_params = [{transform_indices = @transform_0, window_bounds = array<i64: 1, 128>}, {transform_indices = @transform_1, window_bounds = array<i64: 1, 128>}, {transform_indices = @transform_2, window_bounds = array<i64: 1, 128>}, {pipeline_mode = #tpu.pipeline_mode<synchronous>, transform_indices = @transform_3, window_bounds = array<i64: 32, 128>}, {pipeline_mode = #tpu.pipeline_mode<synchronous>, transform_indices = @transform_4, window_bounds = array<i64: 8, 32>}, {transform_indices = @transform_5, window_bounds = array<i64: 1, 1, 128>}, {transform_indices = @transform_6, window_bounds = array<i64: 1, 1, 128>}, {transform_indices = @transform_7, window_bounds = array<i64: 1, 1, 8>}]} {
    %c0_i32 = arith.constant 0 : i32
    %0 = arith.cmpi eq, %arg1, %c0_i32 : i32
    %1 = arith.extui %0 : i1 to i32
    %c0_i32_0 = arith.constant 0 : i32
    %2 = arith.cmpi ne, %1, %c0_i32_0 : i32
    scf.if %2 {
      %cst_18 = arith.constant 0.000000e+00 : f32
      %46 = vector.broadcast %cst_18 : f32 to vector<1x1x128xf32>
      %c0_19 = arith.constant 0 : index
      %c0_20 = arith.constant 0 : index
      %c0_21 = arith.constant 0 : index
      %47 = vector.load %arg7[%c0_19, %c0_20, %c0_21] : memref<1x1x128xf32, #tpu.memory_space<vmem>>, vector<1x1x128xf32>
      tpu.vector_store %arg7[%c0_19, %c0_20, %c0_21], %46 {strides = array<i32>} : memref<1x1x128xf32, #tpu.memory_space<vmem>>, vector<1x1x128xf32>,
      %cst_22 = arith.constant 0.000000e+00 : f32
      %48 = vector.broadcast %cst_22 : f32 to vector<1x1x128xf32>
      %c0_23 = arith.constant 0 : index
      %c0_24 = arith.constant 0 : index
      %c0_25 = arith.constant 0 : index
      %49 = vector.load %arg8[%c0_23, %c0_24, %c0_25] : memref<1x1x128xf32, #tpu.memory_space<vmem>>, vector<1x1x128xf32>
      tpu.vector_store %arg8[%c0_23, %c0_24, %c0_25], %48 {strides = array<i32>} : memref<1x1x128xf32, #tpu.memory_space<vmem>>, vector<1x1x128xf32>,
      %cst_26 = arith.constant 0.000000e+00 : f32
      %50 = vector.broadcast %cst_26 : f32 to vector<1x1x8xf32>
      %c0_27 = arith.constant 0 : index
      %c0_28 = arith.constant 0 : index
      %c0_29 = arith.constant 0 : index
      %51 = vector.load %arg9[%c0_27, %c0_28, %c0_29] : memref<1x1x8xf32, #tpu.memory_space<vmem>>, vector<1x1x8xf32>
      tpu.vector_store %arg9[%c0_27, %c0_28, %c0_29], %50 {strides = array<i32>} : memref<1x1x8xf32, #tpu.memory_space<vmem>>, vector<1x1x8xf32>,
    } else {
    }
    %c0_i32_1 = arith.constant 0 : i32
    %3 = arith.cmpi eq, %arg0, %c0_i32_1 : i32
    %c0_i32_2 = arith.constant 0 : i32
    %4 = arith.cmpi eq, %arg1, %c0_i32_2 : i32
    %5 = arith.andi %3, %4 : i1
    %6 = arith.extui %5 : i1 to i32
    %c0_i32_3 = arith.constant 0 : i32
    %7 = arith.cmpi ne, %6, %c0_i32_3 : i32
    scf.if %7 {
      %c0_18 = arith.constant 0 : index
      %c0_19 = arith.constant 0 : index
      %46 = vector.load %arg6[%c0_18, %c0_19] : memref<8x32xf32, #tpu.memory_space<vmem>>, vector<8x32xf32>
      %cst_20 = arith.constant dense<0.000000e+00> : vector<8x8xf32>
      %47 = tpu.matmul %46, %46, %cst_20 {dimension_numbers = #tpu.dot_dimension_numbers<[1], [1], [0], [0], [0, 0, 1, 0], [], []>} : vector<8x32xf32>, vector<8x32xf32>, vector<8x8xf32> -> vector<8x8xf32>
      %48 = tpu.iota {dimensions = array<i32: 0>} : vector<8x8xi32>
      %49 = tpu.iota {dimensions = array<i32: 1>} : vector<8x8xi32>
      %50 = arith.mulf %46, %46 : vector<8x32xf32>
      %cst_21 = arith.constant dense<0.000000e+00> : vector<8xf32>
      %51 = vector.multi_reduction <add>, %50, %cst_21 [1] : vector<8x32xf32> to vector<8xf32>
      %52 = vector.shape_cast %51 : vector<8xf32> to vector<8x1xf32>
      %53 = arith.cmpi eq, %48, %49 : vector<8x8xi32>
      %cst_22 = arith.constant 0.000000e+00 : f32
      %54 = vector.broadcast %cst_22 : f32 to vector<8x8xf32>
      %55 = arith.select %53, %47, %54 : vector<8x8xi1>, vector<8x8xf32>
      %cst_23 = arith.constant dense<0.000000e+00> : vector<8xf32>
      %56 = vector.multi_reduction <add>, %55, %cst_23 [0] : vector<8x8xf32> to vector<8xf32>
      %57 = vector.shape_cast %56 : vector<8xf32> to vector<1x8xf32>
      %58 = vector.broadcast %52 : vector<8x1xf32> to vector<8x8xf32>
      %59 = vector.broadcast %57 : vector<1x8xf32> to vector<8x8xf32>
      %60 = arith.addf %58, %59 : vector<8x8xf32>
      %cst_24 = arith.constant 2.000000e+00 : f32
      %61 = vector.broadcast %cst_24 : f32 to vector<8x8xf32>
      %62 = arith.mulf %61, %47 : vector<8x8xf32>
      %63 = arith.subf %60, %62 : vector<8x8xf32>
      %cst_25 = arith.constant 0.000000e+00 : f32
      %64 = vector.broadcast %cst_25 : f32 to vector<8x8xf32>
      %65 = arith.maximumf %63, %64 : vector<8x8xf32>
      %66 = arith.cmpi slt, %48, %49 : vector<8x8xi32>
      %c4_i32 = arith.constant 4 : i32
      %67 = vector.broadcast %c4_i32 : i32 to vector<8x8xi32>
      %68 = arith.cmpi slt, %49, %67 : vector<8x8xi32>
      %69 = arith.andi %66, %68 : vector<8x8xi1>
      %cst_26 = arith.constant 1.000000e+00 : f32
      %70 = vector.broadcast %cst_26 : f32 to vector<8x8xf32>
      %71 = arith.select %69, %65, %70 : vector<8x8xi1>, vector<8x8xf32>
      %72 = math.sqrt %71 : vector<8x8xf32>
      %cst_27 = arith.constant 0.000000e+00 : f32
      %73 = vector.broadcast %cst_27 : f32 to vector<8x8xf32>
      %74 = arith.select %69, %72, %73 : vector<8x8xi1>, vector<8x8xf32>
      %cst_28 = arith.constant dense<0.000000e+00> : vector<8xf32>
      %75 = vector.multi_reduction <add>, %74, %cst_28 [0] : vector<8x8xf32> to vector<8xf32>
      %76 = vector.shape_cast %75 : vector<8xf32> to vector<1x8xf32>
      %77 = vector.shape_cast %76 : vector<1x8xf32> to vector<1x1x8xf32>
      %c0_29 = arith.constant 0 : index
      %c0_30 = arith.constant 0 : index
      %c0_31 = arith.constant 0 : index
      %78 = vector.load %arg9[%c0_29, %c0_30, %c0_31] : memref<1x1x8xf32, #tpu.memory_space<vmem>>, vector<1x1x8xf32>
      tpu.vector_store %arg9[%c0_29, %c0_30, %c0_31], %77 {strides = array<i32>} : memref<1x1x8xf32, #tpu.memory_space<vmem>>, vector<1x1x8xf32>,
    } else {
    }
    %c0 = arith.constant 0 : index
    %c0_4 = arith.constant 0 : index
    %8 = vector.load %arg5[%c0, %c0_4] : memref<32x128xf32, #tpu.memory_space<vmem>>, vector<32x128xf32>
    %c0_5 = arith.constant 0 : index
    %c0_6 = arith.constant 0 : index
    %9 = vector.load %arg2[%c0_5, %c0_6] : memref<1x128xi32, #tpu.memory_space<vmem>>, vector<1x128xi32>
    %c0_7 = arith.constant 0 : index
    %c0_8 = arith.constant 0 : index
    %10 = vector.load %arg3[%c0_7, %c0_8] : memref<1x128xi32, #tpu.memory_space<vmem>>, vector<1x128xi32>
    %11 = tpu.iota {dimensions = array<i32: 0>} : vector<128x128xi32>
    %12 = vector.broadcast %9 : vector<1x128xi32> to vector<128x128xi32>
    %13 = arith.cmpi eq, %11, %12 : vector<128x128xi32>
    %14 = arith.extui %13 : vector<128x128xi1> to vector<128x128xi32>
    %15 = arith.sitofp %14 : vector<128x128xi32> to vector<128x128xf32>
    %16 = vector.broadcast %10 : vector<1x128xi32> to vector<128x128xi32>
    %17 = arith.cmpi eq, %11, %16 : vector<128x128xi32>
    %18 = arith.extui %17 : vector<128x128xi1> to vector<128x128xi32>
    %19 = arith.sitofp %18 : vector<128x128xi32> to vector<128x128xf32>
    %cst = arith.constant dense<0.000000e+00> : vector<32x128xf32>
    %20 = tpu.matmul %8, %15, %cst {dimension_numbers = #tpu.dot_dimension_numbers<[1], [0], [0], [1], [0, 0, 1, 1], [], []>} : vector<32x128xf32>, vector<128x128xf32>, vector<32x128xf32> -> vector<32x128xf32>
    %cst_9 = arith.constant dense<0.000000e+00> : vector<32x128xf32>
    %21 = tpu.matmul %8, %19, %cst_9 {dimension_numbers = #tpu.dot_dimension_numbers<[1], [0], [0], [1], [0, 0, 1, 1], [], []>} : vector<32x128xf32>, vector<128x128xf32>, vector<32x128xf32> -> vector<32x128xf32>
    %22 = arith.subf %20, %21 : vector<32x128xf32>
    %cst_10 = arith.constant 9.99999997E-7 : f32
    %23 = vector.broadcast %cst_10 : f32 to vector<32x128xf32>
    %24 = arith.addf %22, %23 : vector<32x128xf32>
    %25 = arith.mulf %24, %24 : vector<32x128xf32>
    %cst_11 = arith.constant dense<0.000000e+00> : vector<128xf32>
    %26 = vector.multi_reduction <add>, %25, %cst_11 [0] : vector<32x128xf32> to vector<128xf32>
    %27 = vector.shape_cast %26 : vector<128xf32> to vector<1x128xf32>
    %28 = math.sqrt %27 : vector<1x128xf32>
    %c0_12 = arith.constant 0 : index
    %c0_13 = arith.constant 0 : index
    %29 = vector.load %arg4[%c0_12, %c0_13] : memref<1x128xf32, #tpu.memory_space<vmem>>, vector<1x128xf32>
    %30 = arith.subf %28, %29 : vector<1x128xf32>
    %31 = arith.subf %28, %29 : vector<1x128xf32>
    %32 = arith.mulf %30, %31 : vector<1x128xf32>
    %cst_14 = arith.constant 1.000000e-07 : f32
    %33 = vector.broadcast %cst_14 : f32 to vector<1x128xf32>
    %34 = arith.addf %29, %33 : vector<1x128xf32>
    %35 = tpu.reciprocal %34 {approx = true} : vector<1x128xf32> -> vector<1x128xf32>
    %c1_i32 = arith.constant 1 : i32
    %36 = arith.muli %arg0, %c1_i32 : i32
    %37 = arith.addi %36, %arg1 : i32
    %c128_i32 = arith.constant 128 : i32
    %38 = arith.muli %37, %c128_i32 : i32
    %c128_i32_15 = arith.constant 128 : i32
    %39 = arith.addi %38, %c128_i32_15 : i32
    %c24_i32 = arith.constant 24 : i32
    %40 = arith.cmpi sle, %39, %c24_i32 : i32
    %41 = arith.extui %40 : i1 to i32
    %c0_i32_16 = arith.constant 0 : i32
    %42 = arith.cmpi ne, %41, %c0_i32_16 : i32
    scf.if %42 {
      %c0_18 = arith.constant 0 : index
      %c0_19 = arith.constant 0 : index
      %c0_20 = arith.constant 0 : index
      %46 = vector.load %arg7[%c0_18, %c0_19, %c0_20] : memref<1x1x128xf32, #tpu.memory_space<vmem>>, vector<1x1x128xf32>
      %47 = vector.shape_cast %32 : vector<1x128xf32> to vector<1x1x128xf32>
      %48 = arith.addf %46, %47 : vector<1x1x128xf32>
      %c0_21 = arith.constant 0 : index
      %c0_22 = arith.constant 0 : index
      %c0_23 = arith.constant 0 : index
      %49 = vector.load %arg7[%c0_21, %c0_22, %c0_23] : memref<1x1x128xf32, #tpu.memory_space<vmem>>, vector<1x1x128xf32>
      tpu.vector_store %arg7[%c0_21, %c0_22, %c0_23], %48 {strides = array<i32>} : memref<1x1x128xf32, #tpu.memory_space<vmem>>, vector<1x1x128xf32>,
      %c0_24 = arith.constant 0 : index
      %c0_25 = arith.constant 0 : index
      %c0_26 = arith.constant 0 : index
      %50 = vector.load %arg8[%c0_24, %c0_25, %c0_26] : memref<1x1x128xf32, #tpu.memory_space<vmem>>, vector<1x1x128xf32>
      %51 = vector.shape_cast %35 : vector<1x128xf32> to vector<1x1x128xf32>
      %52 = arith.addf %50, %51 : vector<1x1x128xf32>
      %c0_27 = arith.constant 0 : index
      %c0_28 = arith.constant 0 : index
      %c0_29 = arith.constant 0 : index
      %53 = vector.load %arg8[%c0_27, %c0_28, %c0_29] : memref<1x1x128xf32, #tpu.memory_space<vmem>>, vector<1x1x128xf32>
      tpu.vector_store %arg8[%c0_27, %c0_28, %c0_29], %52 {strides = array<i32>} : memref<1x1x128xf32, #tpu.memory_space<vmem>>, vector<1x1x128xf32>,
    } else {
    }
    %true = arith.constant true
    %43 = arith.xori %40, %true : i1
    %44 = arith.extui %43 : i1 to i32
    %c0_i32_17 = arith.constant 0 : i32
    %45 = arith.cmpi ne, %44, %c0_i32_17 : i32
    scf.if %45 {
      %46 = tpu.iota {dimensions = array<i32: 1>} : vector<1x128xi32>
      %47 = vector.broadcast %38 : i32 to vector<1x128xi32>
      %48 = arith.addi %47, %46 : vector<1x128xi32>
      %c24_i32_18 = arith.constant 24 : i32
      %49 = vector.broadcast %c24_i32_18 : i32 to vector<1x128xi32>
      %50 = arith.cmpi slt, %48, %49 : vector<1x128xi32>
      %c0_19 = arith.constant 0 : index
      %c0_20 = arith.constant 0 : index
      %c0_21 = arith.constant 0 : index
      %51 = vector.load %arg7[%c0_19, %c0_20, %c0_21] : memref<1x1x128xf32, #tpu.memory_space<vmem>>, vector<1x1x128xf32>
      %cst_22 = arith.constant 0.000000e+00 : f32
      %52 = vector.broadcast %cst_22 : f32 to vector<1x128xf32>
      %53 = arith.select %50, %32, %52 : vector<1x128xi1>, vector<1x128xf32>
      %54 = vector.shape_cast %53 : vector<1x128xf32> to vector<1x1x128xf32>
      %55 = arith.addf %51, %54 : vector<1x1x128xf32>
      %c0_23 = arith.constant 0 : index
      %c0_24 = arith.constant 0 : index
      %c0_25 = arith.constant 0 : index
      %56 = vector.load %arg7[%c0_23, %c0_24, %c0_25] : memref<1x1x128xf32, #tpu.memory_space<vmem>>, vector<1x1x128xf32>
      tpu.vector_store %arg7[%c0_23, %c0_24, %c0_25], %55 {strides = array<i32>} : memref<1x1x128xf32, #tpu.memory_space<vmem>>, vector<1x1x128xf32>,
      %c0_26 = arith.constant 0 : index
      %c0_27 = arith.constant 0 : index
      %c0_28 = arith.constant 0 : index
      %57 = vector.load %arg8[%c0_26, %c0_27, %c0_28] : memref<1x1x128xf32, #tpu.memory_space<vmem>>, vector<1x1x128xf32>
      %cst_29 = arith.constant 0.000000e+00 : f32
      %58 = vector.broadcast %cst_29 : f32 to vector<1x128xf32>
      %59 = arith.select %50, %35, %58 : vector<1x128xi1>, vector<1x128xf32>
      %60 = vector.shape_cast %59 : vector<1x128xf32> to vector<1x1x128xf32>
      %61 = arith.addf %57, %60 : vector<1x1x128xf32>
      %c0_30 = arith.constant 0 : index
      %c0_31 = arith.constant 0 : index
      %c0_32 = arith.constant 0 : index
      %62 = vector.load %arg8[%c0_30, %c0_31, %c0_32] : memref<1x1x128xf32, #tpu.memory_space<vmem>>, vector<1x1x128xf32>
      tpu.vector_store %arg8[%c0_30, %c0_31, %c0_32], %61 {strides = array<i32>} : memref<1x1x128xf32, #tpu.memory_space<vmem>>, vector<1x1x128xf32>,
    } else {
    }
    return
  }
  func.func @transform_0(%arg0: i32, %arg1: i32) -> (i32, i32) {
    %c1_i32 = arith.constant 1 : i32
    %0 = arith.muli %arg0, %c1_i32 : i32
    %1 = arith.addi %0, %arg1 : i32
    %c0_i32 = arith.constant 0 : i32
    %c0_i32_0 = arith.constant 0 : i32
    return %c0_i32, %1 : i32, i32
  }
  func.func @transform_1(%arg0: i32, %arg1: i32) -> (i32, i32) {
    %c1_i32 = arith.constant 1 : i32
    %0 = arith.muli %arg0, %c1_i32 : i32
    %1 = arith.addi %0, %arg1 : i32
    %c0_i32 = arith.constant 0 : i32
    %c0_i32_0 = arith.constant 0 : i32
    return %c0_i32, %1 : i32, i32
  }
  func.func @transform_2(%arg0: i32, %arg1: i32) -> (i32, i32) {
    %c1_i32 = arith.constant 1 : i32
    %0 = arith.muli %arg0, %c1_i32 : i32
    %1 = arith.addi %0, %arg1 : i32
    %c0_i32 = arith.constant 0 : i32
    %c0_i32_0 = arith.constant 0 : i32
    return %c0_i32, %1 : i32, i32
  }
  func.func @transform_3(%arg0: i32, %arg1: i32) -> (i32, i32) {
    %c0_i32 = arith.constant 0 : i32
    %c0_i32_0 = arith.constant 0 : i32
    %c0_i32_1 = arith.constant 0 : i32
    return %c0_i32, %c0_i32_0 : i32, i32
  }
  func.func @transform_4(%arg0: i32, %arg1: i32) -> (i32, i32) {
    %c0_i32 = arith.constant 0 : i32
    %c0_i32_0 = arith.constant 0 : i32
    %c0_i32_1 = arith.constant 0 : i32
    return %c0_i32, %c0_i32_0 : i32, i32
  }
  func.func @transform_5(%arg0: i32, %arg1: i32) -> (i32, i32, i32) {
    %c0_i32 = arith.constant 0 : i32
    %c0_i32_0 = arith.constant 0 : i32
    %c0_i32_1 = arith.constant 0 : i32
    return %arg0, %c0_i32, %c0_i32_0 : i32, i32, i32
  }
  func.func @transform_6(%arg0: i32, %arg1: i32) -> (i32, i32, i32) {
    %c0_i32 = arith.constant 0 : i32
    %c0_i32_0 = arith.constant 0 : i32
    %c0_i32_1 = arith.constant 0 : i32
    return %arg0, %c0_i32, %c0_i32_0 : i32, i32, i32
  }
  func.func @transform_7(%arg0: i32, %arg1: i32) -> (i32, i32, i32) {
    %c0_i32 = arith.constant 0 : i32
    %c0_i32_0 = arith.constant 0 : i32
    %c0_i32_1 = arith.constant 0 : i32
    return %arg0, %c0_i32, %c0_i32_0 : i32, i32, i32
  }
}

</mosaic_0001>

<bundles_post_ra>
// kernel: tpu_custom_call.1
= control target key start
LH: loop header
LB: loop body
LE: loop exit
PB: predicated region body
PF: predicated region fallthrough
CT: control target
= control target key end

     0   :  { %s2187_s0 = inlined_call_operand.hbm [shape: s32[1,256], index: 0, kind: input, shape index: {}]   ;;  %s2188_s1 = inlined_call_operand.vmem [shape: s32[1,256], index: 1, kind: input, shape index: {}]   ;;  %s2189_s2 = inlined_call_operand.vmem [shape: f32[1,256], index: 2, kind: input, shape index: {}]   ;;  %s2190_s3 = inlined_call_operand.hbm [shape: f32[32,128], index: 3, kind: input, shape index: {}]   ;;  %s2191_s4 = inlined_call_operand.vmem [shape: f32[8,32], index: 4, kind: input, shape index: {}]   ;;  %s2192_s5 = inlined_call_operand.hbm [shape: f32[2,1,128], index: 5, kind: output, shape index: {0}]   ;;  %s2193_s6 = inlined_call_operand.hbm [shape: f32[2,1,128], index: 6, kind: output, shape index: {1}]   ;;  %s2194_s7 = inlined_call_operand.hbm [shape: f32[2,1,8], index: 7, kind: output, shape index: {2}]  }
   0x1   :  { %2199 = sst [smem:[#allocation15_spill]] %s2187_s0 }
   0x2   :  { %2200 = sst [smem:[#allocation16_spill]] %s2190_s3 }
   0x3   :  { %13 = vsyncpa [#allocation3], 0 }
   0x4   :  { %15 = vsyncpa [#allocation3 + $0x1], 0 }
   0x5   :  { %16 = vsyncpa [#allocation6], 0 }
   0x6   :  { %17 = vsyncpa [#allocation4], 0 }
   0x7   :  { %19 = vsyncpa [#allocation4 + $0x1], 0 }
   0x8   :  { %20 = vsyncpa [#allocation9], 0 }
   0x9   :  { %22 = vsyncpa [#allocation9 + $0x1], 0  ;;  %s1695_s24 = smov 0   ;;  %s1697_s25 = smov 0  }
   0xa   :  { %s1699_s26 = smov 0   ;;  %s1701_s27 = smov 0  }
   0xb   :  { %s1703_s28 = smov 0   ;;  %s1705_s29 = smov 0  }
   0xc LB: > { %s1726_s30 = sadd.s32 4294967295, %s1642_s29   ;;  %s2198_s8 = sadd.s32 4294967294, %s1642_s29   ;;  %s1642_s29 = sphi %s1705_s29, %s28_s29   ;;  %s1638_s28 = sphi %s1703_s28, %s2238_s28   ;;  %s1634_s27 = sphi %s1701_s27, %s2237_s27   ;;  %s1630_s26 = sphi %s1699_s26, %s2236_s26   ;;  %s1626_s25 = sphi %s1697_s25, %s2235_s25   ;;  %s1622_s24 = sphi %s1695_s24, %s2234_s24  }
   0xd   : > { %p62_p0 = scmp.ne.s32.totalorder %s1626_s25, %s1622_s24  ;;  %p2195_p1 = scmp.eq.s32.totalorder %s1726_s30, 0 }
   0xe   : > { %p190_p3 = scmp.eq.s32.totalorder %s2198_s8, 1  ;;  %p1072_p5 = scmp.ge.s32.totalorder %s1642_s29, 1 }
   0xf   : > { %p1737_p4 = por %p2195_p1, %p62_p0  ;;  %p249_p7 = scmp.lt.s32.totalorder %s1642_s29, 3 }
  0x10   : > { %p1742_p6 = por %p190_p3, %p62_p0  ;;  %s1644_s12 = smov [#allocation5]  }
  0x11   : > { %s2201_s9 = scalar_select %p1737_p4, 1, 0 }
  0x12   : > { %s2202_s10 = scalar_select %p1742_p6, 1, 0 }
  0x13   : > { %p1747_p8 = pnand %p1072_p5, %p249_p7  ;;  %s261_s13 = sshll.u32 %s1644_s12, 4  ;;  %s262_s13 = int_to_ptr.vmem [resolvable:$true] %s261_s13 }
  0x14   : > { %s40_s15 = sadd.s32 1, %s1638_s28  ;;  %s2205_s3 = sld [smem:[#allocation16_spill]] }
  0x15   : > { %s2203_s11 = scalar_select %p1747_p8, 1, 0 }
  0x16   : > { %p1355_p9 = pneg %p1747_p8 }
  0x18   : > { %p1756_p11 = pnand %p1355_p9, %p2195_p1 }
  0x1a   : > { %s1438_s18 = scalar_lea.hbm %s2205_s3, 512  ;;  %p1440_p13 = pneg %p1756_p11 }
  0x1b   : > { %p1439_p12 = scmp.ne.s32.totalorder %s2205_s3, %s1438_s18  ;;  %p1445_p5 = scmp.lt.u32.totalorder %s1438_s18, %s2205_s3 }
  0x1d   : > { %p1441_p0 = pnand %p1440_p13, %p1439_p12 }
  0x1f   : > { %p1442_p3 = pneg %p1441_p0 }
  0x21   : > { %p1447_p7 = pnand %p1445_p5, %p1442_p3 }
  0x23   : > { %1450 = shalt.err (!%p1447_p7)
}
  0x24   : > { %s1451_s23 = scalar_lea.vmem %s262_s13, 512  ;;  %p1459_p2 = scmp.lt.s32.totalorder %s262_s13, %s262_s13 }
  0x25   : > { %p1452_p9 = scmp.ne.s32.totalorder %s262_s13, %s1451_s23  ;;  %p1460_p6 = scmp.lt.s32.totalorder %s1451_s23, %s1451_s23 }
  0x27   : > { %p1454_p10 = pnand %p1452_p9, %p1440_p13  ;;  %p1461_p4 = por %p1460_p6, %p1459_p2 }
  0x29   : > { %p1455_p1 = pneg %p1454_p10 }
  0x2b   : > { %p1462_p8 = pnand %p1461_p4, %p1455_p1 }
  0x2d   : > { %1465 = shalt.err (!%p1462_p8)
}
  0x2e   : > { %s1645_s12 = smov 128   ;;  %s1646_s16 = smov 8  }
  0x2f   : > { %1358 = dma.hbm_to_vmem [thread:$0]  (!%p1756_p11), %s2205_s3, 512, %s262_s13, [#allocation6], %s1645_s12, %s1645_s12, %s1646_s16  }
  0x30   : > { %p42_p1 = scmp.ge.s32.totalorder %s40_s15, 2  ;;  %p56_p2 = scmp.ne.s32.totalorder %s1630_s26, %s1626_s25 }
  0x31   : > { %p57_p4 = scmp.eq.s32.totalorder %s1642_s29, 0  ;;  %s49_s19 = sadd.s32 1, %s1630_s26 }
  0x32   : > { %s2240_s15 = smov (%p42_p1, %s40_s15), 0  ;;  %p2206_p6 = scmp.eq.s32.totalorder %s1726_s30, 1 }
  0x33   : > { %s46_s21 = ssub.s32 %s1638_s28, %s2240_s15  ;;  %p58_p10 = por %p57_p4, %p56_p2 }
  0x34   : > { %p1785_p8 = por %p2206_p6, %p56_p2  ;;  %p47_p12 = scmp.eq.s32.totalorder %s46_s21, 0 }
  0x35   : > { %s278_s14 = sand.u32 1, %s1630_s26   ;;  %p1374_p13 = scmp.lt.s32.totalorder %s1642_s29, 2 }
  0x36   : > { %s1794_s22 = scalar_select %p47_p12, %s1630_s26, %s49_s19  }
  0x37   : > { %s1075_s13 = sshll.u32 %s1638_s28, 4  ;;  %s281_s23 = scalar_lea.vmem [#allocation2], %s278_s14 }
  0x38   : > { %s289_s12 = sshll.u32 %s281_s23, 4  ;;  %s2208_s0 = sld [smem:[#allocation15_spill]]  ;;  %s1802_s12 = int_to_ptr.vmem [resolvable:$true] %s289_s12 }
  0x39   : > { %p1804_p11 = pnand %p1374_p13, %p58_p10  ;;  %s279_s19 = scalar_lea.sflag [#allocation3], %s278_s14 }
  0x3b   : > { %p1468_p3 = pneg %p1804_p11 }
  0x3e   : > { %s1800_s18 = scalar_lea.hbm %s2208_s0, %s1075_s13  ;;  %s1471_s16 = scalar_lea.hbm %s2208_s0, 32 }
  0x3f   : > { %s1466_s8 = scalar_lea.hbm %s1800_s18, 16  ;;  %p1472_p9 = scmp.lt.u32.totalorder %s1800_s18, %s2208_s0 }
  0x40   : > { %p1467_p0 = scmp.ne.s32.totalorder %s1800_s18, %s1466_s8  ;;  %p1473_p1 = scmp.lt.u32.totalorder %s1471_s16, %s1466_s8 }
  0x41   : > { %p1475_p4 = scmp.lt.u32.totalorder %s1466_s8, %s1800_s18 }
  0x42   : > { %p1469_p5 = pnand %p1468_p3, %p1467_p0  ;;  %p1474_p2 = por %p1473_p1, %p1472_p9 }
  0x44   : > { %p1470_p7 = pneg %p1469_p5  ;;  %p1476_p6 = por %p1475_p4, %p1474_p2 }
  0x46   : > { %p1477_p10 = pnand %p1476_p6, %p1470_p7 }
  0x48   : > { %1480 = shalt.err (!%p1477_p10)
}
  0x49   : > { %s1481_s14 = scalar_lea.vmem %s1802_s12, 16  ;;  %s1647_s13 = smov [#allocation2]  }
  0x4a   : > { %p1482_p12 = scmp.ne.s32.totalorder %s1802_s12, %s1481_s14  ;;  %s1486_s23 = sshll.u32 %s1647_s13, 4  ;;  %s1487_s23 = int_to_ptr.vmem [resolvable:$false] %s1486_s23 }
  0x4b   : > { %s1488_s3 = scalar_lea.vmem %s1487_s23, 32  ;;  %p1489_p5 = scmp.lt.s32.totalorder %s1802_s12, %s1487_s23 }
  0x4c   : > { %p1484_p13 = pnand %p1482_p12, %p1468_p3  ;;  %p1490_p9 = scmp.lt.s32.totalorder %s1488_s3, %s1481_s14 }
  0x4e   : > { %p1485_p0 = pneg %p1484_p13  ;;  %p1491_p1 = por %p1490_p9, %p1489_p5 }
  0x50   : > { %p1492_p2 = pnand %p1491_p1, %p1485_p0 }
  0x52   : > { %1495 = shalt.err (!%p1492_p2)
}
  0x53   : > { %1362 = dma.hbm_to_vmem [thread:$0]  (!%p1804_p11), %s1800_s18, 16, %s1802_s12, %s279_s19  }
  0x54   : > { %p2210_p7 = scmp.ne.s32.totalorder %s2203_s11, 0 }
  0x55   : > { %s1836_s8 = sand.u32 (!%p2210_p7), 1, %s1626_s25   ;;  %p2211_p3 = scmp.ne.s32.totalorder (!%p2210_p7), %s2201_s9, 0 }
  0x56   : > { %314 = sbr.rel (%p2210_p7) target bundleno = 752 (0x2f0), region = 40  ;;  %s317_s16 = scalar_lea.sflag (!%p2210_p7), [#allocation3], %s1836_s8 }
  0x5d   : > { %1605 = dma.done.wait (%p2211_p3), %s317_s16, 16  }
  0x5e   : > { %1607 = vsyncadd (%p2211_p3), %s317_s16, 4294967280  ;;  %p2212_p4 = scmp.eq.s32.totalorder %s1726_s30, 0 }
  0x60   : > { %1609 = dma.done.wait (%p2212_p4), [#allocation6], 512   ;;  %p2213_p11 = pmov %p2212_p4 }
  0x61   : > { %p370_p6 = scmp.lt.s32.totalorder %s1634_s27, 1  ;;  %vm385_vm0 = vcmask 57344   ;;  %s1850_s11 = scalar_lea.vmem [#allocation7], %s1836_s8  ;;  %v1648_v0 = vmov 0.0  }
  0x62   : > { %1611 = vsyncadd (%p2213_p11), [#allocation6], 4294966784  ;;  %383 = vst [vmem:[%s1850_s11] sm:$0x1] %v1648_v0  ;;  %s1857_s12 = scalar_lea.vmem [#allocation8], %s1836_s8  ;;  %s1861_s18 = scalar_lea.vmem [#allocation10], %s1836_s8 }
  0x63   : > { %s1854_s9 = scalar_select %p370_p6, %s1634_s27, 1  ;;  %384 = vst [vmem:[%s1857_s12] sm:$0x1] %v1648_v0  ;;  %386 = vst.msk [vmem:[%s1861_s18] sm:$0x1] %vm385_vm0, %v1648_v0 }
  0x64   : > { %p387_p10 = scmp.eq.s32.totalorder %s1634_s27, 0 }
  0x65   : > { %s372_s14 = scalar_lea.vmem %s2188_s1, %s1854_s9  ;;  %s377_s3 = scalar_lea.vmem %s2189_s2, %s1854_s9  ;;  %v392_v1 = vld [vmem:[%s2191_s4] sm:$0xff] (%p387_p10)  ;;  %vm393_vm1 = vcmask (%p387_p10), 261120   ;;  %v1649_v2 = vmov (%p387_p10), 0.0   ;;  %vm1650_vm2 = vmmov (%p387_p10), 0   ;;  %v467_v5 = vlaneseq (%p387_p10) }
  0x66   : > { %391 = sbr.rel (!%p387_p10) target bundleno = 369 (0x171), region = 56  ;;  %1198 = vmatprep.subr.mxu0 (%p387_p10), %v1649_v2  ;;  %1200 = vmatprep.mubr.msk.f32.mxu0 (%p387_p10), %vm1650_vm2, %v1649_v2  ;;  %v471_v3 = vmul.f32 (%p387_p10), %v392_v1, %v392_v1  ;;  %vm477_vm4 = vcmask (%p387_p10), 64512  }
  0x67   : > { %1199 = vmatpush3.xpose.msk.msra.mxu0 (%p387_p10), %vm393_vm1, %v392_v1  ;;  %v468_v6 = vshrl.u32 (%p387_p10), %v467_v5, 7  ;;  %v470_v7 = vand.u32 (%p387_p10), 127, %v467_v5 }
  0x68   : > { %v472_v4 = vsel (%p387_p10), %vm393_vm1, %v471_v3, 0.0 }
  0x69   : > { %473 = vadd.xlane.f32.xlu0 (%p387_p10), %v472_v4  ;;  %vm475_vm3 = vcmp.eq.s32.totalorder (%p387_p10), %v468_v6, %v470_v7  ;;  %vm489_vm5 = vcmp.lt.s32.totalorder (%p387_p10), %v468_v6, %v470_v7  ;;  %vm490_vm6 = vcmp.lt.s32.totalorder (%p387_p10), %v470_v7, 4 }
  0x6a   : > { %1201 = vmatmul.mubr.msk.f32.vlgmr.msra.gmra.mrb[0].mxu0 (%p387_p10), %vm393_vm1, %v392_v1  ;;  %vm491_vm7 = vmand (%p387_p10), %vm489_vm5, %vm490_vm6 }
  0xf6   : > { %v474_v17 = vpop.xlane.xlu0 %473 }
 0x13d   : > { %v463_v8 = vpop.f32.mrb[0].mxu0 }
 0x13e   : > { %v476_v9 = vsel %vm475_vm3, %v463_v8, 0.0  ;;  %v1202_v10 = vpop.f32.mrb[1].mxu0  ;;  %v486_v19 = vmul.f32 2.0, %v463_v8 }
 0x13f   : > { %v478_v11 = vsel %vm477_vm4, %v476_v9, 0.0 }
 0x140   : > { %v479_v12 = vrot.slane %v478_v11, 4 }
 0x142   : > { %v480_v13 = vadd.f32 %v479_v12, %v478_v11 }
 0x144   : > { %v481_v14 = vrot.slane %v480_v13, 2 }
 0x146   : > { %v482_v15 = vadd.f32 %v481_v14, %v480_v13 }
 0x148   : > { %v483_v16 = vrot.slane %v482_v15, 1 }
 0x14a   : > { %v484_v18 = vadd.f32 %v483_v16, %v482_v15 }
 0x14c   : > { %v485_v20 = vadd.f32 %v484_v18, %v474_v17 }
 0x14e   : > { %v487_v21 = vsub.f32 %v485_v20, %v486_v19 }
 0x150   : > { %v488_v22 = vmax.f32 %v487_v21, 0.0 }
 0x152   : > { %v492_v23 = vsel %vm491_vm7, %v488_v22, 1.0 }
 0x153   : > { %1432 = vrsqrt.f32 %v492_v23  ;;  %vm495_vm8 = vcmp.eq.f32.partialorder %v492_v23, inf  ;;  %v498_v26 = vand.u32 2147483648, %v492_v23  ;;  %vm497_vm9 = vcmp.eq.f32.partialorder %v492_v23, 0.0 }
 0x15d   : > { %v1433_v24 = vpop.eup %1432 }
 0x15e   : > { %v494_v25 = vmul.f32 %v1433_v24, %v492_v23 }
 0x160   : > { %v496_v27 = vsel %vm495_vm8, %v492_v23, %v494_v25 }
 0x161   : > { %v499_v28 = vsel %vm497_vm9, %v498_v26, %v496_v27 }
 0x162   : > { %v500_v29 = vsel %vm491_vm7, %v499_v28, 0.0 }
 0x163   : > { %v501_v30 = vsel %vm477_vm4, %v500_v29, 0.0 }
 0x164   : > { %v502_v31 = vrot.slane %v501_v30, 4 }
 0x166   : > { %v503_v32 = vadd.f32 %v502_v31, %v501_v30 }
 0x168   : > { %v504_v33 = vrot.slane %v503_v32, 2 }
 0x16a   : > { %v505_v34 = vadd.f32 %v504_v33, %v503_v32 }
 0x16c   : > { %v506_v35 = vrot.slane %v505_v34, 1 }
 0x16e   : > { %v507_v36 = vadd.f32 %v506_v35, %v505_v34 }
 0x170   : > { %509 = vst.msk [vmem:[%s1861_s18] sm:$0x1] %vm385_vm0, %v507_v36 }
 0x171 PF: > { %v516_v37 = vlaneseq  ;;  %s2214_s17 = scalar_lea.vmem [#allocation2], %s1836_s8  ;;  %v510_v39 = vld [vmem:[#allocation5] sm:$0xff]  ;;  %v1893_v41 = vld [vmem:[%s372_s14] ss:$0 sm:$0xff]  ;;  %v1651_v47 = vmov 1.0|1.0  }
 0x172   : > { %v1883_v38 = vld [vmem:[%s2214_s17] ss:$0 sm:$0xff]  ;;  %1235 = vmatprep.mubr.f32.mxu0 %v510_v39  ;;  %1273 = vmatprep.mubr.f32.mxu1 %v510_v39  ;;  %v511_v2 = vld [vmem:[#allocation5 + $0x8] sm:$0xff]  ;;  %v513_v4 = vld [vmem:[#allocation5 + $0x18] sm:$0xff]  ;;  %s1147_s23 = sshll.u32 %s1634_s27, 7 }
 0x173   : > { %v1886_v40 = vshrl.u32 %v516_v37, 7  ;;  %v512_v3 = vld [vmem:[#allocation5 + $0x10] sm:$0xff]  ;;  %s2052_s16 = sadd.s32 128, %s1147_s23 }
 0x174   : > { %v835_v5 = vld [vmem:[%s377_s3] sm:$0x1]  ;;  %p1148_p12 = scmp.gt.s32.totalorder %s2052_s16, 24 }
 0x175   : > { %v518_v42 = vadd.s32 8, %v1886_v40  ;;  %vm537_vm10 = vcmp.eq.s32.totalorder %v1886_v40, %v1883_v38  ;;  %v519_v43 = vadd.s32 16, %v1886_v40  ;;  %vm589_vm11 = vcmp.eq.s32.totalorder %v1886_v40, %v1893_v41 }
 0x176   : > { %v520_v44 = vadd.s32 24, %v1886_v40  ;;  %v521_v45 = vadd.s32 32, %v1886_v40  ;;  %v522_v46 = vadd.s32 40, %v1886_v40  ;;  %v523_v48 = vadd.s32 48, %v1886_v40 }
 0x177   : > { %vm538_vm12 = vcmp.eq.s32.totalorder %v518_v42, %v1883_v38  ;;  %vm590_vm13 = vcmp.eq.s32.totalorder %v518_v42, %v1893_v41  ;;  %vm539_vm14 = vcmp.eq.s32.totalorder %v519_v43, %v1883_v38  ;;  %vm591_vm1 = vcmp.eq.s32.totalorder %v519_v43, %v1893_v41 }
 0x178   : > { %vm1279_vm15 = vmpackc.low %vm538_vm12, %vm537_vm10  ;;  %vm540_vm0 = vcmp.eq.s32.totalorder %v520_v44, %v1883_v38  ;;  %vm592_vm2 = vcmp.eq.s32.totalorder %v520_v44, %v1893_v41  ;;  %vm541_vm4 = vcmp.eq.s32.totalorder %v521_v45, %v1883_v38  ;;  %vm542_vm5 = vcmp.eq.s32.totalorder %v522_v46, %v1883_v38 }
 0x179   : > { %1280 = vmatprep.subr.msk.bf16.mxu0 %vm1279_vm15, %v1651_v47  ;;  %vm1311_vm3 = vmpackc.low %vm590_vm13, %vm589_vm11  ;;  %v524_v49 = vadd.s32 56, %v1886_v40  ;;  %vm593_vm7 = vcmp.eq.s32.totalorder %v521_v45, %v1893_v41  ;;  %vm594_vm8 = vcmp.eq.s32.totalorder %v522_v46, %v1893_v41  ;;  %vm543_vm12 = vcmp.eq.s32.totalorder %v523_v48, %v1883_v38  ;;  %v847_v45 = vld [vmem:[%s1850_s11] sm:$0x1] (!%p1148_p12) }
 0x17a   : > { %1312 = vmatprep.subr.msk.bf16.mxu1 %vm1311_vm3, %v1651_v47  ;;  %1282 = vmatpush3.bf16.msk.msra.mxu0 %vm1279_vm15, %v1651_v47  ;;  %vm1283_vm6 = vmpackc.low %vm540_vm0, %vm539_vm14  ;;  %v525_v52 = vadd.s32 64, %v1886_v40  ;;  %v526_v53 = vadd.s32 72, %v1886_v40  ;;  %vm595_vm14 = vcmp.eq.s32.totalorder %v523_v48, %v1893_v41  ;;  %v527_v56 = vadd.s32 80, %v1886_v40  ;;  %v850_v46 = vld [vmem:[%s1857_s12] sm:$0x1] (!%p1148_p12) }
 0x17b   : > { %1314 = vmatpush3.bf16.msk.msra.mxu1 %vm1311_vm3, %v1651_v47  ;;  %1284 = vmatprep.subr.msk.bf16.mxu0 %vm1283_vm6, %v1651_v47  ;;  %vm1315_vm9 = vmpackc.low %vm592_vm2, %vm591_vm1  ;;  %vm544_vm13 = vcmp.eq.s32.totalorder %v524_v49, %v1883_v38  ;;  %vm596_vm15 = vcmp.eq.s32.totalorder %v524_v49, %v1893_v41  ;;  %v528_v57 = vadd.s32 88, %v1886_v40  ;;  %v529_v60 = vadd.s32 96, %v1886_v40 }
 0x17c   : > { %1316 = vmatprep.subr.msk.bf16.mxu1 %vm1315_vm9, %v1651_v47  ;;  %vm1926_vm10 = vmpackc.low %vm542_vm5, %vm541_vm4  ;;  %vm545_vm2 = vcmp.eq.s32.totalorder %v525_v52, %v1883_v38  ;;  %vm546_vm3 = vcmp.eq.s32.totalorder %v526_v53, %v1883_v38  ;;  %vm597_vm4 = vcmp.eq.s32.totalorder %v525_v52, %v1893_v41  ;;  %vm598_vm5 = vcmp.eq.s32.totalorder %v526_v53, %v1893_v41 }
 0x17d   : > { %vm1930_vm11 = vmpackc.low %vm594_vm8, %vm593_vm7  ;;  %vm547_vm8 = vcmp.eq.s32.totalorder %v527_v56, %v1883_v38  ;;  %v530_v61 = vadd.s32 104, %v1886_v40  ;;  %v531_v0 = vadd.s32 112, %v1886_v40  ;;  %v532_v1 = vadd.s32 120, %v1886_v40 }
 0x17e   : > { %1286 = vmatpush3.bf16.msk.msra.mxu0 %vm1283_vm6, %v1651_v47  ;;  %vm1948_vm0 = vmpackc.low %vm544_vm13, %vm543_vm12  ;;  %v838_v6 = vadd.f32 1e-07, %v835_v5 }
 0x17f   : > { %1318 = vmatpush3.bf16.msk.msra.mxu1 %vm1315_vm9, %v1651_v47  ;;  %1288 = vmatprep.subr.msk.bf16.mxu0 %vm1926_vm10, %v1651_v47  ;;  %vm1952_vm1 = vmpackc.low %vm596_vm15, %vm595_vm14  ;;  %vm548_vm9 = vcmp.eq.s32.totalorder %v528_v57, %v1883_v38  ;;  %vm549_vm14 = vcmp.eq.s32.totalorder %v529_v60, %v1883_v38  ;;  %vm550_vm15 = vcmp.eq.s32.totalorder %v530_v61, %v1883_v38 }
 0x180   : > { %1320 = vmatprep.subr.msk.bf16.mxu1 %vm1930_vm11, %v1651_v47  ;;  %vm1974_vm6 = vmpackc.low %vm546_vm3, %vm545_vm2  ;;  %1434 = vrcp.f32 %v838_v6 }
 0x181   : > { %vm1978_vm7 = vmpackc.low %vm598_vm5, %vm597_vm4  ;;  %vm551_vm4 = vcmp.eq.s32.totalorder %v531_v0, %v1883_v38  ;;  %vm552_vm5 = vcmp.eq.s32.totalorder %v532_v1, %v1883_v38 }
 0x182   : > { %1290 = vmatpush3.bf16.msk.msra.mxu0 %vm1926_vm10, %v1651_v47  ;;  %vm599_vm10 = vcmp.eq.s32.totalorder %v527_v56, %v1893_v41  ;;  %vm2000_vm12 = vmpackc.low %vm548_vm9, %vm547_vm8 }
 0x183   : > { %1322 = vmatpush3.bf16.msk.msra.mxu1 %vm1930_vm11, %v1651_v47  ;;  %1292 = vmatprep.subr.msk.bf16.mxu0 %vm1948_vm0, %v1651_v47  ;;  %vm600_vm11 = vcmp.eq.s32.totalorder %v528_v57, %v1893_v41  ;;  %vm1303_vm2 = vmpackc.low %vm550_vm15, %vm549_vm14 }
 0x184   : > { %1324 = vmatprep.subr.msk.bf16.mxu1 %vm1952_vm1, %v1651_v47  ;;  %vm2004_vm13 = vmpackc.low %vm600_vm11, %vm599_vm10 }
 0x185   : > { %vm1307_vm8 = vmpackc.low %vm552_vm5, %vm551_vm4 }
 0x186   : > { %1294 = vmatpush3.bf16.msk.msra.mxu0 %vm1948_vm0, %v1651_v47  ;;  %vm601_vm0 = vcmp.eq.s32.totalorder %v529_v60, %v1893_v41 }
 0x187   : > { %1326 = vmatpush3.bf16.msk.msra.mxu1 %vm1952_vm1, %v1651_v47  ;;  %1296 = vmatprep.subr.msk.bf16.mxu0 %vm1974_vm6, %v1651_v47  ;;  %vm602_vm1 = vcmp.eq.s32.totalorder %v530_v61, %v1893_v41 }
 0x188   : > { %1328 = vmatprep.subr.msk.bf16.mxu1 %vm1978_vm7, %v1651_v47  ;;  %vm1335_vm3 = vmpackc.low %vm602_vm1, %vm601_vm0 }
 0x18a   : > { %1298 = vmatpush3.bf16.msk.msra.mxu0 %vm1974_vm6, %v1651_v47  ;;  %vm603_vm6 = vcmp.eq.s32.totalorder %v531_v0, %v1893_v41  ;;  %v1435_v7 = vpop.eup %1434 }
 0x18b   : > { %1330 = vmatpush3.bf16.msk.msra.mxu1 %vm1978_vm7, %v1651_v47  ;;  %1300 = vmatprep.subr.msk.bf16.mxu0 %vm2000_vm12, %v1651_v47  ;;  %vm604_vm7 = vcmp.eq.s32.totalorder %v532_v1, %v1893_v41  ;;  %v851_v48 = vadd.f32 (!%p1148_p12), %v1435_v7, %v850_v46 }
 0x18c   : > { %1332 = vmatprep.subr.msk.bf16.mxu1 %vm2004_vm13, %v1651_v47  ;;  %vm1339_vm9 = vmpackc.low %vm604_vm7, %vm603_vm6 }
 0x18d   : > { %852 = vst [vmem:[%s1857_s12] sm:$0x1] (!%p1148_p12), %v851_v48 }
 0x18e   : > { %1302 = vmatpush3.bf16.msk.msra.mxu0 %vm2000_vm12, %v1651_v47 }
 0x18f   : > { %1334 = vmatpush3.bf16.msk.msra.mxu1 %vm2004_vm13, %v1651_v47  ;;  %1304 = vmatprep.subr.msk.bf16.mxu0 %vm1303_vm2, %v1651_v47 }
 0x190   : > { %1336 = vmatprep.subr.msk.bf16.mxu1 %vm1335_vm3, %v1651_v47 }
 0x192   : > { %1306 = vmatpush3.bf16.msk.msra.mxu0 %vm1303_vm2, %v1651_v47 }
 0x193   : > { %1338 = vmatpush3.bf16.msk.msra.mxu1 %vm1335_vm3, %v1651_v47  ;;  %1308 = vmatprep.subr.msk.bf16.mxu0 %vm1307_vm8, %v1651_v47 }
 0x194   : > { %1340 = vmatprep.subr.msk.bf16.mxu1 %vm1339_vm9, %v1651_v47 }
 0x196   : > { %1310 = vmatpush3.bf16.msk.msra.mxu0 %vm1307_vm8, %v1651_v47 }
 0x197   : > { %1342 = vmatpush3.bf16.msk.msra.mxu1 %vm1339_vm9, %v1651_v47 }
 0x199   : > { %1236 = vmatmul.mubr.f32.vlgmr.msra.gmra.mrb[0].mxu0 %v511_v2 }
 0x19a   : > { %1274 = vmatmul.mubr.f32.vlgmr.msra.gmra.mrb[0].mxu1 %v511_v2  ;;  %1238 = vmatprep.mubr.f32.mxu0 %v512_v3 }
 0x19b   : > { %1276 = vmatprep.mubr.f32.mxu1 %v512_v3 }
 0x19d   : > { %1239 = vmatmul.mubr.f32.gmra.mrb[2].mxu0 %v513_v4 }
 0x19e   : > { %1277 = vmatmul.mubr.f32.gmra.mrb[2].mxu1 %v513_v4 }
 0x26c   : > { %v1237_v8 = vpop.f32.mrb[0].mxu0 }
 0x26d   : > { %v1275_v9 = vpop.f32.mrb[0].mxu1  ;;  %v703_v10 = vpop.f32.mrb[1].mxu0 }
 0x26e   : > { %v808_v11 = vsub.f32 %v1237_v8, %v1275_v9  ;;  %v788_v12 = vpop.f32.mrb[1].mxu1 }
 0x26f   : > { %v807_v13 = vsub.f32 %v703_v10, %v788_v12 }
 0x270   : > { %v812_v14 = vadd.f32 1e-06, %v808_v11  ;;  %v1240_v15 = vpop.f32.mrb[2].mxu0 }
 0x271   : > { %v811_v16 = vadd.f32 1e-06, %v807_v13  ;;  %v1278_v17 = vpop.f32.mrb[2].mxu1  ;;  %v713_v18 = vpop.f32.mrb[3].mxu0 }
 0x272   : > { %v816_v19 = vmul.f32 %v812_v14, %v812_v14  ;;  %v810_v20 = vsub.f32 %v1240_v15, %v1278_v17  ;;  %v798_v21 = vpop.f32.mrb[3].mxu1 }
 0x273   : > { %v815_v22 = vmul.f32 %v811_v16, %v811_v16  ;;  %v809_v23 = vsub.f32 %v713_v18, %v798_v21 }
 0x274   : > { %v814_v25 = vadd.f32 1e-06, %v810_v20 }
 0x275   : > { %v819_v24 = vadd.f32 %v816_v19, %v815_v22  ;;  %v813_v26 = vadd.f32 1e-06, %v809_v23 }
 0x276   : > { %v818_v28 = vmul.f32 %v814_v25, %v814_v25 }
 0x277   : > { %v817_v27 = vmul.f32 %v813_v26, %v813_v26 }
 0x279   : > { %v820_v29 = vadd.f32 %v819_v24, %v817_v27 }
 0x27b   : > { %v821_v30 = vadd.f32 %v820_v29, %v818_v28 }
 0x27d   : > { %v822_v31 = vrot.slane %v821_v30, 4 }
 0x27f   : > { %v823_v32 = vadd.f32 %v822_v31, %v821_v30 }
 0x281   : > { %v824_v33 = vrot.slane %v823_v32, 2 }
 0x283   : > { %v825_v34 = vadd.f32 %v824_v33, %v823_v32 }
 0x285   : > { %v826_v35 = vrot.slane %v825_v34, 1 }
 0x287   : > { %v827_v36 = vadd.f32 %v826_v35, %v825_v34 }
 0x289   : > { %1436 = vrsqrt.f32 %v827_v36  ;;  %vm830_vm10 = vcmp.eq.f32.partialorder %v827_v36, inf  ;;  %v833_v40 = vand.u32 2147483648, %v827_v36  ;;  %vm832_vm11 = vcmp.eq.f32.partialorder %v827_v36, 0.0 }
 0x293   : > { %v1437_v38 = vpop.eup %1436 }
 0x294   : > { %v829_v39 = vmul.f32 %v1437_v38, %v827_v36  ;;  %846 = sbr.rel (%p1148_p12) target bundleno = 671 (0x29f), region = 60 }
 0x296   : > { %v831_v41 = vsel %vm830_vm10, %v827_v36, %v829_v39 }
 0x297   : > { %v834_v42 = vsel %vm832_vm11, %v833_v40, %v831_v41 }
 0x298   : > { %v836_v43 = vsub.f32 %v834_v42, %v835_v5 }
 0x29a   : > { %v837_v44 = vmul.f32 %v836_v43, %v836_v43 }
 0x29c   : > { %v848_v47 = vadd.f32 %v847_v45, %v837_v44 }
 0x29e   : > { %849 = vst [vmem:[%s1850_s11] sm:$0x1] %v848_v47 }
 0x29f PF: > { %p1149_p13 = scmp.le.s32.totalorder %s2052_s16, 24 }
 0x2a0   : > { %v858_v49 = vand.u32 (!%p1149_p13), 127, %v516_v37  ;;  %v859_v50 = vstv (!%p1149_p13), %s1147_s23  ;;  %v866_v53 = vld [vmem:[%s1857_s12] sm:$0x1] (!%p1149_p13) }
 0x2a1   : > { %856 = sbr.rel (%p1149_p13) target bundleno = 681 (0x2a9), region = 64 }
 0x2a2   : > { %v860_v51 = vadd.s32 (!%p1149_p13), %v859_v50, %v858_v49 }
 0x2a4   : > { %vm861_vm12 = vcmp.lt.s32.totalorder (!%p1149_p13), %v860_v51, 24 }
 0x2a5   : > { %v862_v52 = vld [vmem:[%s1850_s11] sm:$0x1] (!%p1149_p13)  ;;  %v863_v54 = vsel (!%p1149_p13), %vm861_vm12, %v837_v44, 0.0  ;;  %v867_v55 = vsel (!%p1149_p13), %vm861_vm12, %v1435_v7, 0.0 }
 0x2a6   : > { %v864_v56 = vadd.f32 (!%p1149_p13), %v863_v54, %v862_v52  ;;  %v868_v57 = vadd.f32 (!%p1149_p13), %v867_v55, %v866_v53 }
 0x2a8   : > { %865 = vst [vmem:[%s1850_s11] sm:$0x1] %v864_v56  ;;  %869 = vst [vmem:[%s1857_s12] sm:$0x1] %v868_v57 }
 0x2a9 PF: > { %s874_s9 = sand.u32 1, %s1726_s30   ;;  %s2069_s3 = sshll.u32 %s1634_s27, 4 }
 0x2aa   : > { %s2075_s19 = scalar_lea.hbm %s2193_s6, %s2069_s3  ;;  %s904_s14 = sshll.u32 %s1857_s12, 4  ;;  %s2078_s14 = int_to_ptr.vmem [resolvable:$true] %s904_s14 }
 0x2ab   : > { %s2084_s16 = scalar_lea.hbm %s2192_s5, %s2069_s3  ;;  %s2086_s27 = scalar_lea.sflag [#allocation9], %s874_s9 }
 0x2ac   : > { %s1496_s30 = scalar_lea.vmem %s2078_s14, 16  ;;  %s1652_s17 = smov [#allocation8]  }
 0x2ad   : > { %p1497_p0 = scmp.ne.s32.totalorder %s2078_s14, %s1496_s30  ;;  %s1500_s21 = sshll.u32 %s1652_s17, 4  ;;  %s1501_s21 = int_to_ptr.vmem [resolvable:$false] %s1500_s21 }
 0x2ae   : > { %s1502_s12 = scalar_lea.vmem %s1501_s21, 32  ;;  %p1503_p1 = scmp.lt.s32.totalorder %s2078_s14, %s1501_s21 }
 0x2af   : > { %p1498_p5 = pnand %p1497_p0, %p1785_p8  ;;  %p1504_p2 = scmp.lt.s32.totalorder %s1502_s12, %s1496_s30 }
 0x2b1   : > { %p1499_p9 = pneg %p1498_p5  ;;  %p1505_p7 = por %p1504_p2, %p1503_p1 }
 0x2b3   : > { %p1506_p3 = pnand %p1505_p7, %p1499_p9 }
 0x2b5   : > { %1509 = shalt.err (!%p1506_p3)
}
 0x2b6   : > { %s1510_s9 = scalar_lea.hbm %s2075_s19, 16  ;;  %s1514_s17 = scalar_lea.hbm %s2193_s6, 32 }
 0x2b7   : > { %p1511_p4 = scmp.ne.s32.totalorder %s2075_s19, %s1510_s9  ;;  %p1515_p10 = scmp.lt.u32.totalorder %s2075_s19, %s2193_s6 }
 0x2b8   : > { %p1516_p12 = scmp.lt.u32.totalorder %s1514_s17, %s1510_s9  ;;  %p1518_p0 = scmp.lt.u32.totalorder %s1510_s9, %s2075_s19 }
 0x2b9   : > { %p1512_p11 = pnand %p1511_p4, %p1785_p8 }
 0x2ba   : > { %p1517_p13 = por %p1516_p12, %p1515_p10 }
 0x2bb   : > { %p1513_p6 = pneg %p1512_p11 }
 0x2bc   : > { %p1519_p5 = por %p1518_p0, %p1517_p13 }
 0x2be   : > { %p1520_p9 = pnand %p1519_p5, %p1513_p6 }
 0x2c0   : > { %1523 = shalt.err (!%p1520_p9)
}
 0x2c1   : > { %1350 = dma.vmem_to_hbm [thread:$0]  (%p1785_p8), %s2078_s14, 16, %s2075_s19, %s2086_s27  }
 0x2c2   : > { %s891_s30 = sshll.u32 %s1850_s11, 4  ;;  %s2115_s13 = scalar_lea.hbm %s2194_s7, %s2069_s3  ;;  %s2117_s30 = int_to_ptr.vmem [resolvable:$true] %s891_s30 }
 0x2c3   : > { %s917_s9 = sshll.u32 %s1861_s18, 4  ;;  %s871_s23 = scalar_lea.sflag [#allocation4], %s1836_s8  ;;  %s918_s9 = int_to_ptr.vmem [resolvable:$true] %s917_s9 }
 0x2c4   : > { %s1524_s17 = scalar_lea.vmem %s2117_s30, 16  ;;  %s1653_s21 = smov [#allocation7]  }
 0x2c5   : > { %p1525_p1 = scmp.ne.s32.totalorder %s2117_s30, %s1524_s17  ;;  %s1528_s19 = sshll.u32 %s1653_s21, 4  ;;  %s1529_s19 = int_to_ptr.vmem [resolvable:$false] %s1528_s19 }
 0x2c6   : > { %s1530_s11 = scalar_lea.vmem %s1529_s19, 32  ;;  %p1531_p3 = scmp.lt.s32.totalorder %s2117_s30, %s1529_s19 }
 0x2c7   : > { %p1526_p2 = pnand %p1525_p1, %p1785_p8  ;;  %p1532_p4 = scmp.lt.s32.totalorder %s1530_s11, %s1524_s17 }
 0x2c9   : > { %p1527_p7 = pneg %p1526_p2  ;;  %p1533_p11 = por %p1532_p4, %p1531_p3 }
 0x2cb   : > { %p1534_p6 = pnand %p1533_p11, %p1527_p7 }
 0x2cd   : > { %1537 = shalt.err (!%p1534_p6)
}
 0x2ce   : > { %s1538_s8 = scalar_lea.hbm %s2084_s16, 16  ;;  %s1542_s0 = scalar_lea.hbm %s2192_s5, 32 }
 0x2cf   : > { %p1539_p10 = scmp.ne.s32.totalorder %s2084_s16, %s1538_s8  ;;  %p1543_p0 = scmp.lt.u32.totalorder %s2084_s16, %s2192_s5 }
 0x2d0   : > { %p1544_p5 = scmp.lt.u32.totalorder %s1542_s0, %s1538_s8  ;;  %p1546_p1 = scmp.lt.u32.totalorder %s1538_s8, %s2084_s16 }
 0x2d1   : > { %p1540_p12 = pnand %p1539_p10, %p1785_p8 }
 0x2d2   : > { %p1545_p9 = por %p1544_p5, %p1543_p0 }
 0x2d3   : > { %p1541_p13 = pneg %p1540_p12 }
 0x2d4   : > { %p1547_p2 = por %p1546_p1, %p1545_p9 }
 0x2d6   : > { %p1548_p7 = pnand %p1547_p2, %p1541_p13 }
 0x2d8   : > { %1551 = shalt.err (!%p1548_p7)
}
 0x2d9   : > { %1349 = dma.vmem_to_hbm [thread:$0]  (%p1785_p8), %s2117_s30, 16, %s2084_s16, %s871_s23  }
 0x2da   : > { %s1552_s17 = scalar_lea.vmem %s918_s9, 16  ;;  %s1654_s19 = smov [#allocation10]  }
 0x2db   : > { %p1553_p3 = scmp.ne.s32.totalorder %s918_s9, %s1552_s17  ;;  %s1556_s11 = sshll.u32 %s1654_s19, 4  ;;  %s1557_s11 = int_to_ptr.vmem [resolvable:$false] %s1556_s11 }
 0x2dc   : > { %s1558_s8 = scalar_lea.vmem %s1557_s11, 32  ;;  %p1559_p6 = scmp.lt.s32.totalorder %s918_s9, %s1557_s11 }
 0x2dd   : > { %p1554_p4 = pnand %p1553_p3, %p1785_p8  ;;  %p1560_p10 = scmp.lt.s32.totalorder %s1558_s8, %s1552_s17 }
 0x2df   : > { %p1555_p11 = pneg %p1554_p4  ;;  %p1561_p12 = por %p1560_p10, %p1559_p6 }
 0x2e1   : > { %p1562_p13 = pnand %p1561_p12, %p1555_p11 }
 0x2e3   : > { %1565 = shalt.err (!%p1562_p13)
}
 0x2e4   : > { %s1566_s18 = scalar_lea.hbm %s2115_s13, 16  ;;  %s1570_s23 = scalar_lea.hbm %s2194_s7, 32 }
 0x2e5   : > { %p1567_p0 = scmp.ne.s32.totalorder %s2115_s13, %s1566_s18  ;;  %p1571_p1 = scmp.lt.u32.totalorder %s2115_s13, %s2194_s7 }
 0x2e6   : > { %p1572_p2 = scmp.lt.u32.totalorder %s1570_s23, %s1566_s18  ;;  %p1574_p3 = scmp.lt.u32.totalorder %s1566_s18, %s2115_s13 }
 0x2e7   : > { %p1568_p5 = pnand %p1567_p0, %p1785_p8 }
 0x2e8   : > { %p1573_p7 = por %p1572_p2, %p1571_p1 }
 0x2e9   : > { %p1569_p9 = pneg %p1568_p5 }
 0x2ea   : > { %p1575_p4 = por %p1574_p3, %p1573_p7 }
 0x2ec   : > { %p1576_p11 = pnand %p1575_p4, %p1569_p9 }
 0x2ee   : > { %1579 = shalt.err (!%p1576_p11)
}
 0x2ef   : > { %1351 = dma.vmem_to_hbm [thread:$0]  (%p1785_p8), %s918_s9, 16, %s2115_s13, %s2086_s27  }
 0x2f0 PF: > { %s929_s0 = sand.u32 1, %s1622_s24   ;;  %p2231_p6 = scmp.ne.s32.totalorder %s2202_s10, 0 }
 0x2f1   : > { %p2232_p10 = scmp.ge.s32.totalorder %s1642_s29, 2  ;;  %s930_s12 = scalar_lea.sflag [#allocation4], %s929_s0 }
 0x2f3   : > { %p1364_p12 = pnand %p2232_p10, %p2231_p6 }
 0x2f5   : > { %1613 = dma.done.wait (!%p1364_p12), %s930_s12, 16  }
 0x2f6   : > { %1615 = vsyncadd (!%p1364_p12), %s930_s12, 4294967280  ;;  %s2233_s21 = sadd.s32 4294967294, %s1642_s29  }
 0x2f7   : > { %s937_s17 = sand.u32 1, %s2233_s21  }
 0x2f8   : > { %s938_s19 = scalar_lea.sflag [#allocation9], %s937_s17 }
 0x2f9   : > { %1617 = dma.done.wait (!%p1364_p12), %s938_s19, 32  }
 0x2fa   : > { %1619 = vsyncadd (!%p1364_p12), %s938_s19, 4294967264  ;;  %s28_s29 = sadd.s32 1, %s1642_s29   ;;  %s2234_s24 = smov %s1626_s25 }
 0x2fb   : > { %p25_p8 = scmp.ge.s32.totalorder %s28_s29, 4   ;;  %s2235_s25 = smov %s1630_s26 }
 0x2fc   : > { %s2236_s26 = smov %s1794_s22  ;;  %s2237_s27 = smov %s1638_s28 }
 0x2fd   : > { %s2238_s28 = smov %s2240_s15  ;;  %27 = sbr.rel (!%p25_p8) target bundleno = 12 (0xc), region = 143 }
 0x304   :  { %950 = vsyncpa [#allocation3], 1 }
 0x305   :  { %952 = vsyncpa [#allocation3 + $0x1], 1 }
 0x306   :  { %953 = vsyncpa [#allocation6], 1 }
 0x307   :  { %954 = vsyncpa [#allocation4], 1 }
 0x308   :  { %956 = vsyncpa [#allocation4 + $0x1], 1 }
 0x309   :  { %957 = vsyncpa [#allocation9], 1 }
 0x30a   :  { %959 = vsyncpa [#allocation9 + $0x1], 1 }

</bundles_post_ra>
